<compile_context>
chip_gen: v7x
topology: tpu7x:2x2x1
jax: 0.10.0
libtpu: 0.0.40
codegen_flags: <defaults>
</compile_context>

<pallas_src>
import functools

import numpy as np
import jax
import jax.numpy as jnp
from jax.experimental import pallas as pl
from jax.experimental.pallas import tpu as pltpu


def _round_up(x, m):
    return ((x + m - 1) // m) * m


def _proto_loss_kernel(emb_ref, supw_ref, label_ref, out_ref, *, n_classes, n_query):
    # bf16 storage, f32 compute (see header note on the bf16-dot executor limitation).
    emb = emb_ref[...].astype(jnp.float32)       # (Np, Dp)
    sup_w = supw_ref[...].astype(jnp.float32)    # (Cp, Np)
    labels = label_ref[...]                      # (Np, 1) int32, -1 = not a query row

    # Class prototypes (weighted mean of support rows).
    protos = jnp.dot(sup_w, emb, preferred_element_type=jnp.float32)      # (Cp, Dp)

    # ||p||^2 per class as a (1, Cp) row: VPU square + XLU lane reduce + tiny relayout.
    p2 = jnp.transpose(jnp.sum(protos * protos, axis=1, keepdims=True))   # (1, Cp)

    # Cross term 2 * x.p computed as emb . protos^T via dot_general (trans_b), so no
    # explicit transpose is materialized; the factor of 2 (exact power-of-two scale) is
    # folded into the small (Cp, Dp) operand rather than the (Np, Cp) result.
    xp2 = jax.lax.dot_general(
        emb, 2.0 * protos,
        dimension_numbers=(((1,), (1,)), ((), ())),
        preferred_element_type=jnp.float32)                               # (Np, Cp)

    # logits = -||x - p||^2 up to a per-row constant (||x||^2 cancels in log_softmax).
    logits = xp2 - p2                                                     # (Np, Cp)

    npad, cpad = logits.shape
    col = jax.lax.broadcasted_iota(jnp.int32, (npad, cpad), 1)
    # Padded class columns must never win softmax / argmax.
    logits = jnp.where(col < n_classes, logits, jnp.float32(-1e30))

    # Shifted logits: row-max of z is exactly 0.0; reused for both loss and argmax.
    m = jnp.max(logits, axis=1, keepdims=True)                            # (Np, 1)
    z = logits - m                                                        # (Np, Cp)
    lse = jnp.log(jnp.sum(jnp.exp(z), axis=1, keepdims=True))             # (Np, 1)

    is_query = labels >= 0                                                # (Np, 1)
    inv_q = jnp.float32(1.0 / float(n_query))

    # loss = mean over query rows of (lse - z[row, true class]).  Label -1 never matches
    # a column index, so support / padded rows contribute nothing to the z-gather.
    z_true = jnp.sum(jnp.where(col == labels, z, 0.0), axis=1, keepdims=True)    # (Np, 1)
    loss11 = (jnp.sum(jnp.where(is_query, lse, 0.0), axis=0, keepdims=True)
              - jnp.sum(z_true, axis=0, keepdims=True)) * inv_q                  # (1, 1)

    # argmax over classes (lowest index on ties, matching numpy/torch) via z == 0.0.
    pred = jnp.min(jnp.where(z == 0.0, col, cpad), axis=1, keepdims=True)        # (Np, 1)
    correct = jnp.logical_and(pred == labels, is_query)
    acc11 = jnp.sum(jnp.where(correct, 1.0, 0.0), axis=0, keepdims=True) * inv_q  # (1, 1)

    # Lane-dense output slab: lane 0 = loss, lane 1 = acc, rest 0.
    lane = jax.lax.broadcasted_iota(jnp.int32, (1, 128), 1)
    out_ref[...] = jnp.where(lane == 0, loss11, jnp.where(lane == 1, acc11, 0.0))


def prototypical_loss(embeddings, target, min_count):
    emb = jnp.asarray(embeddings, dtype=jnp.float32)
    t = np.asarray(target)
    n, d = emb.shape

    # ---- Host-side glue (value-dependent shapes, resolved at trace time) ----
    classes, counts = np.unique(t, return_counts=True)
    filt = classes[counts >= min_count]
    if filt.size == 0:
        raise ValueError("no class has at least min_count samples")

    c = int(filt.size)
    n_pad = _round_up(n, 16)     # bf16 sublane packing for emb rows
    d_pad = _round_up(d, 128)    # lane / MXU contraction dim
    c_pad = _round_up(c, 16)     # protos rows; logits lane dim (Mosaic pads lanes to 128)

    # Note: a class with a single sample (ns == 0) gets a zero prototype, matching the
    # bundled reference; min_count >= 2 avoids that degenerate case entirely.
    sup_w = np.zeros((c_pad, n_pad), np.float32)
    labels = np.full((n_pad, 1), -1, np.int32)
    n_query = 0
    for ci, cval in enumerate(filt):
        idxs = np.nonzero(t == cval)[0]
        ns = len(idxs) // 2
        if ns > 0:
            sup_w[ci, idxs[:ns]] = 1.0 / ns
        labels[idxs[ns:], 0] = ci
        n_query += len(idxs) - ns
    if n_query == 0:
        raise ValueError("no query samples")

    emb_bf = jnp.pad(emb.astype(jnp.bfloat16), ((0, n_pad - n), (0, d_pad - d)))
    sup_w_bf = jnp.asarray(sup_w, dtype=jnp.bfloat16)
    labels_j = jnp.asarray(labels)

    kernel = functools.partial(_proto_loss_kernel, n_classes=c, n_query=n_query)

    # VMEM budget: bf16/int32 inputs + f32 intermediates, 2x safety margin, clamped with
    # headroom under v7x's 64 MiB physical VMEM per TensorCore.
    c_lane = max(c_pad, 128)     # Mosaic pads the class lane dim to >= 128 internally
    bytes_in = n_pad * d_pad * 2 + c_pad * n_pad * 2 + n_pad * 4
    bytes_interm = 4 * (c_pad * d_pad + 3 * n_pad * c_lane + 6 * n_pad)
    vmem_limit = int(min(max(2 * (bytes_in + bytes_interm) + (1 << 20), 32 << 20), 56 << 20))

    flops = (2 * c_pad * n_pad * d_pad       # prototypes matmul
             + 2 * n_pad * d_pad * c_pad     # cross-term matmul
             + 3 * c_pad * d_pad             # ||p||^2
             + 12 * n_pad * c_lane)          # masked softmax / argmax epilogue
    transcendentals = n_pad * c_lane + n_pad
    bytes_accessed = bytes_in + 128 * 4

    out = pl.pallas_call(
        kernel,
        out_shape=jax.ShapeDtypeStruct((1, 128), jnp.float32),
        # No grid: whole arrays resident in VMEM, no double-buffering machinery.
        in_specs=[
            pl.BlockSpec(memory_space=pltpu.MemorySpace.VMEM),   # emb
            pl.BlockSpec(memory_space=pltpu.MemorySpace.VMEM),   # sup_w
            pl.BlockSpec(memory_space=pltpu.MemorySpace.VMEM),   # labels
        ],
        out_specs=pl.BlockSpec(memory_space=pltpu.MemorySpace.VMEM),
        compiler_params=pltpu.CompilerParams(vmem_limit_bytes=vmem_limit),
        cost_estimate=pl.CostEstimate(
            flops=flops, transcendentals=transcendentals, bytes_accessed=bytes_accessed),
    )(emb_bf, sup_w_bf, labels_j)

    return out[0, 0], out[0, 1]


class PrototypicalLoss:
    """Pallas port of the PyTorch PrototypicalLoss module."""

    def __init__(self, min_count):
        self.min_count = min_count

    def __call__(self, inputs, target):
        return prototypical_loss(inputs, target, self.min_count)

    forward = __call__


# ------------- reference (numpy, emulating the kernel's bf16-rounded inputs) -------------

def _bf16_round(x):
    return np.asarray(
        jnp.asarray(np.asarray(x, np.float32)).astype(jnp.bfloat16).astype(jnp.float32))


def _reference_numpy(emb, t, min_count):
    emb = _bf16_round(emb)
    classes, counts = np.unique(t, return_counts=True)
    filt = classes[counts >= min_count]
    protos, q_idx, q_cls = [], [], []
    for ci, cval in enumerate(filt):
        idxs = np.nonzero(t == cval)[0]
        ns = len(idxs) // 2
        if ns > 0:
            w = float(_bf16_round(1.0 / ns))
            protos.append((w * emb[idxs[:ns]]).sum(axis=0))
        else:
            protos.append(np.zeros(emb.shape[1], np.float32))
        q_idx.extend(int(i) for i in idxs[ns:])
        q_cls.extend([ci] * (len(idxs) - ns))
    P = np.stack(protos).astype(np.float32)
    Qe = emb[np.array(q_idx)]
    qc = np.array(q_cls)
    dists = ((Qe[:, None, :] - P[None, :, :]) ** 2).sum(-1).astype(np.float32)
    logits = -dists
    logits = logits - logits.max(axis=1, keepdims=True)
    log_p = logits - np.log(np.exp(logits).sum(axis=1, keepdims=True))
    loss = -log_p[np.arange(len(qc)), qc].mean()
    acc = (log_p.argmax(axis=1) == qc).astype(np.float32).mean()
    return np.float32(loss), np.float32(acc)


if __name__ == "__main__":
    key = jax.random.PRNGKey(0)
    N, D = 24, 32
    emb = jax.random.normal(key, (N, D), dtype=jnp.float32)

    # classes: 0 x8, 1 x8, 2 x6, 3 x2 (class 3 is filtered out by min_count=4),
    # deterministically permuted.
    target = np.array([0] * 8 + [1] * 8 + [2] * 6 + [3] * 2, dtype=np.int32)
    perm = np.argsort(np.sin(np.arange(N) * 12.9898))  # deterministic shuffle
    target = target[perm]

    module = PrototypicalLoss(min_count=4)
    loss, acc = module(emb, target)
    loss, acc = jax.block_until_ready((loss, acc))

    ref_loss, ref_acc = _reference_numpy(np.asarray(emb), target, 4)
    assert abs(float(loss) - float(ref_loss)) < 1e-2, (float(loss), float(ref_loss))
    assert abs(float(acc) - float(ref_acc)) < 1e-5, (float(acc), float(ref_acc))

    print("KERNEL_OK")
</pallas_src>

<mosaic_0001>
module attributes {stable_mosaic.version = 11 : i64} {
  func.func @_proto_loss_kernel(%arg0: memref<32x128xbf16, #tpu.memory_space<vmem>>, %arg1: memref<16x32xbf16, #tpu.memory_space<vmem>>, %arg2: memref<32x1xi32, #tpu.memory_space<vmem>>, %arg3: memref<1x128xf32, #tpu.memory_space<vmem>>) attributes {dimension_semantics = [], scalar_prefetch = 0 : i64, scratch_operands = 0 : i64, tpu.core_type = #tpu.core_type<tc>} {
    %c0 = arith.constant 0 : index
    %c0_0 = arith.constant 0 : index
    %0 = vector.load %arg0[%c0, %c0_0] : memref<32x128xbf16, #tpu.memory_space<vmem>>, vector<32x128xbf16>
    %1 = arith.extf %0 : vector<32x128xbf16> to vector<32x128xf32>
    %c0_1 = arith.constant 0 : index
    %c0_2 = arith.constant 0 : index
    %2 = vector.load %arg1[%c0_1, %c0_2] : memref<16x32xbf16, #tpu.memory_space<vmem>>, vector<16x32xbf16>
    %3 = arith.extf %2 : vector<16x32xbf16> to vector<16x32xf32>
    %c0_3 = arith.constant 0 : index
    %c0_4 = arith.constant 0 : index
    %4 = vector.load %arg2[%c0_3, %c0_4] : memref<32x1xi32, #tpu.memory_space<vmem>>, vector<32x1xi32>
    %cst = arith.constant dense<0.000000e+00> : vector<16x128xf32>
    %5 = tpu.matmul %3, %1, %cst {dimension_numbers = #tpu.dot_dimension_numbers<[1], [0], [0], [1], [0, 0, 1, 1], [], []>} : vector<16x32xf32>, vector<32x128xf32>, vector<16x128xf32> -> vector<16x128xf32>
    %6 = arith.mulf %5, %5 : vector<16x128xf32>
    %cst_5 = arith.constant dense<0.000000e+00> : vector<16xf32>
    %7 = vector.multi_reduction <add>, %6, %cst_5 [1] : vector<16x128xf32> to vector<16xf32>
    %8 = vector.shape_cast %7 : vector<16xf32> to vector<16x1xf32>
    %9 = tpu.transpose %8, [1, 0] : vector<16x1xf32> -> vector<1x16xf32>
    %cst_6 = arith.constant 2.000000e+00 : f32
    %10 = vector.broadcast %cst_6 : f32 to vector<16x128xf32>
    %11 = arith.mulf %10, %5 : vector<16x128xf32>
    %cst_7 = arith.constant dense<0.000000e+00> : vector<32x16xf32>
    %12 = tpu.matmul %1, %11, %cst_7 {dimension_numbers = #tpu.dot_dimension_numbers<[1], [1], [0], [0], [0, 0, 1, 0], [], []>} : vector<32x128xf32>, vector<16x128xf32>, vector<32x16xf32> -> vector<32x16xf32>
    %13 = vector.broadcast %9 : vector<1x16xf32> to vector<32x16xf32>
    %14 = arith.subf %12, %13 : vector<32x16xf32>
    %15 = tpu.iota {dimensions = array<i32: 1>} : vector<32x16xi32>
    %c3_i32 = arith.constant 3 : i32
    %16 = vector.broadcast %c3_i32 : i32 to vector<32x16xi32>
    %17 = arith.cmpi slt, %15, %16 : vector<32x16xi32>
    %cst_8 = arith.constant -1.000000e+30 : f32
    %18 = vector.broadcast %cst_8 : f32 to vector<32x16xf32>
    %19 = arith.select %17, %14, %18 : vector<32x16xi1>, vector<32x16xf32>
    %cst_9 = arith.constant dense<0xFF800000> : vector<32xf32>
    %20 = vector.multi_reduction <maximumf>, %19, %cst_9 [1] : vector<32x16xf32> to vector<32xf32>
    %21 = vector.shape_cast %20 : vector<32xf32> to vector<32x1xf32>
    %22 = vector.broadcast %21 : vector<32x1xf32> to vector<32x16xf32>
    %23 = arith.subf %19, %22 : vector<32x16xf32>
    %24 = math.exp %23 : vector<32x16xf32>
    %cst_10 = arith.constant dense<0.000000e+00> : vector<32xf32>
    %25 = vector.multi_reduction <add>, %24, %cst_10 [1] : vector<32x16xf32> to vector<32xf32>
    %26 = vector.shape_cast %25 : vector<32xf32> to vector<32x1xf32>
    %27 = math.log %26 : vector<32x1xf32>
    %c0_i32 = arith.constant 0 : i32
    %28 = vector.broadcast %c0_i32 : i32 to vector<32x1xi32>
    %29 = arith.cmpi sge, %4, %28 : vector<32x1xi32>
    %30 = vector.broadcast %4 : vector<32x1xi32> to vector<32x16xi32>
    %31 = arith.cmpi eq, %15, %30 : vector<32x16xi32>
    %cst_11 = arith.constant 0.000000e+00 : f32
    %32 = vector.broadcast %cst_11 : f32 to vector<32x16xf32>
    %33 = arith.select %31, %23, %32 : vector<32x16xi1>, vector<32x16xf32>
    %cst_12 = arith.constant dense<0.000000e+00> : vector<32xf32>
    %34 = vector.multi_reduction <add>, %33, %cst_12 [1] : vector<32x16xf32> to vector<32xf32>
    %35 = vector.shape_cast %34 : vector<32xf32> to vector<32x1xf32>
    %cst_13 = arith.constant 0.000000e+00 : f32
    %36 = vector.broadcast %cst_13 : f32 to vector<32x1xf32>
    %37 = arith.select %29, %27, %36 : vector<32x1xi1>, vector<32x1xf32>
    %cst_14 = arith.constant dense<0.000000e+00> : vector<1xf32>
    %38 = vector.multi_reduction <add>, %37, %cst_14 [0] : vector<32x1xf32> to vector<1xf32>
    %39 = vector.shape_cast %38 : vector<1xf32> to vector<1x1xf32>
    %cst_15 = arith.constant dense<0.000000e+00> : vector<1xf32>
    %40 = vector.multi_reduction <add>, %35, %cst_15 [0] : vector<32x1xf32> to vector<1xf32>
    %41 = vector.shape_cast %40 : vector<1xf32> to vector<1x1xf32>
    %42 = arith.subf %39, %41 : vector<1x1xf32>
    %cst_16 = arith.constant 0.0909090936 : f32
    %43 = vector.broadcast %cst_16 : f32 to vector<1x1xf32>
    %44 = arith.mulf %42, %43 : vector<1x1xf32>
    %cst_17 = arith.constant 0.000000e+00 : f32
    %45 = vector.broadcast %cst_17 : f32 to vector<32x16xf32>
    %46 = arith.cmpf oeq, %23, %45 : vector<32x16xf32>
    %c16_i32 = arith.constant 16 : i32
    %47 = vector.broadcast %c16_i32 : i32 to vector<32x16xi32>
    %48 = arith.select %46, %15, %47 : vector<32x16xi1>, vector<32x16xi32>
    %cst_18 = arith.constant dense<2147483647> : vector<32xi32>
    %49 = vector.multi_reduction <minsi>, %48, %cst_18 [1] : vector<32x16xi32> to vector<32xi32>
    %50 = vector.shape_cast %49 : vector<32xi32> to vector<32x1xi32>
    %51 = arith.cmpi eq, %50, %4 : vector<32x1xi32>
    %52 = arith.andi %51, %29 : vector<32x1xi1>
    %cst_19 = arith.constant 1.000000e+00 : f32
    %cst_20 = arith.constant 0.000000e+00 : f32
    %53 = vector.broadcast %cst_19 : f32 to vector<32x1xf32>
    %54 = vector.broadcast %cst_20 : f32 to vector<32x1xf32>
    %55 = arith.select %52, %53, %54 : vector<32x1xi1>, vector<32x1xf32>
    %cst_21 = arith.constant dense<0.000000e+00> : vector<1xf32>
    %56 = vector.multi_reduction <add>, %55, %cst_21 [0] : vector<32x1xf32> to vector<1xf32>
    %57 = vector.shape_cast %56 : vector<1xf32> to vector<1x1xf32>
    %cst_22 = arith.constant 0.0909090936 : f32
    %58 = vector.broadcast %cst_22 : f32 to vector<1x1xf32>
    %59 = arith.mulf %57, %58 : vector<1x1xf32>
    %60 = tpu.iota {dimensions = array<i32: 1>} : vector<1x128xi32>
    %c0_i32_23 = arith.constant 0 : i32
    %61 = vector.broadcast %c0_i32_23 : i32 to vector<1x128xi32>
    %62 = arith.cmpi eq, %60, %61 : vector<1x128xi32>
    %c1_i32 = arith.constant 1 : i32
    %63 = vector.broadcast %c1_i32 : i32 to vector<1x128xi32>
    %64 = arith.cmpi eq, %60, %63 : vector<1x128xi32>
    %cst_24 = arith.constant 0.000000e+00 : f32
    %65 = vector.shape_cast %59 : vector<1x1xf32> to vector<1x1xf32>
    %66 = vector.broadcast %65 : vector<1x1xf32> to vector<1x128xf32>
    %67 = vector.broadcast %cst_24 : f32 to vector<1x128xf32>
    %68 = arith.select %64, %66, %67 : vector<1x128xi1>, vector<1x128xf32>
    %69 = vector.shape_cast %44 : vector<1x1xf32> to vector<1x1xf32>
    %70 = vector.broadcast %69 : vector<1x1xf32> to vector<1x128xf32>
    %71 = arith.select %62, %70, %68 : vector<1x128xi1>, vector<1x128xf32>
    %c0_25 = arith.constant 0 : index
    %c0_26 = arith.constant 0 : index
    %72 = vector.load %arg3[%c0_25, %c0_26] : memref<1x128xf32, #tpu.memory_space<vmem>>, vector<1x128xf32>
    tpu.vector_store %arg3[%c0_25, %c0_26], %71 {strides = array<i32>} : memref<1x128xf32, #tpu.memory_space<vmem>>, vector<1x128xf32>,
    return
  }
}

</mosaic_0001>

<bundles_post_ra>
// kernel: tpu_custom_call.1
= control target key start
LH: loop header
LB: loop body
LE: loop exit
PB: predicated region body
PF: predicated region fallthrough
CT: control target
= control target key end

     0   :  { %vm31_vm0 = vcmask 261120   ;;  %s748_s0 = inlined_call_operand.vmem [shape: bf16[32,128], index: 0, kind: input, shape index: {}]   ;;  %s749_s1 = inlined_call_operand.vmem [shape: bf16[16,32], index: 1, kind: input, shape index: {}]   ;;  %s750_s2 = inlined_call_operand.vmem [shape: s32[32,1], index: 2, kind: input, shape index: {}]   ;;  %s751_s3 = inlined_call_operand.hbm [shape: f32[1,128], index: 3, kind: output, shape index: {}]  }
   0x1   :  { %v489_v0 = vld [vmem:[%s748_s0] sm:$0xff]   ;;  %v500_v1 = vld [vmem:[%s748_s0 + $0x8] sm:$0xff]  }
   0x2   :  { %v497_v2 = vld [vmem:[%s749_s1] sm:$0xff]   ;;  %535 = vmatprep.subr.bf16.mxu0 %v489_v0 }
   0x3   :  { %v498_v3 = vunpack.c.l.bf16 %v497_v2 }
   0x4   :  { %8 = vsyncpa [#allocation3], 0  ;;  %537 = vmatpush3.bf16.msra.mxu0 %v489_v0  ;;  %v499_v4 = vunpack.c.h.bf16 %v497_v2  ;;  %v490_v5 = vunpack.c.l.bf16 %v489_v0  ;;  %v491_v13 = vunpack.c.h.bf16 %v489_v0  ;;  %v494_v14 = vunpack.c.l.bf16 %v500_v1  ;;  %v633_v41 = vld [vmem:[%s750_s2 + $0x8] sm:$0xff]  ;;  %v639_v42 = vld [vmem:[%s750_s2 + $0x10] sm:$0xff] }
   0x5   :  { %539 = vmatprep.subr.bf16.mxu0 %v500_v1  ;;  %521 = vmatprep.mubr.msk.f32.mxu0 %vm31_vm0, %v498_v3  ;;  %v495_v15 = vunpack.c.h.bf16 %v500_v1  ;;  %v591_v18 = vmov 0   ;;  %v238_v23 = vlaneseq  ;;  %vm253_vm2 = vcmask 130048   ;;  %v645_v43 = vld [vmem:[%s750_s2 + $0x18] sm:$0xff] }
   0x6   :  { %528 = vmatprep.mubr.f32.mxu1 %v490_v5  ;;  %549 = vset.pattern.permute.xlu0 %v591_v18  ;;  %vm299_vm15 = vcmp.ge.s32.totalorder %v633_v41, 0 }
   0x7   :  { %v239_v24 = vshrl.u32 %v238_v23, 7  ;;  %v623_v26 = vand.u32 127, %v238_v23 }
   0x8   :  { %541 = vmatpush3.bf16.msra.mxu0 %v500_v1 }
   0x9   :  { %v240_v25 = vsub.s32 0, %v239_v24  ;;  %vm248_vm1 = vcmp.lt.s32.totalorder %v623_v26, 3 }
   0xb   :  { %522 = vmatmul.mubr.msk.f32.vlgmr.msra.gmra.mrb[0].mxu0 %vm31_vm0, %v499_v4 }
  0xde   :  { %v523_v6 = vpop.f32.mrb[0].mxu0 }
  0xdf   :  { %v152_v7 = vmul.f32 2.0, %v523_v6  ;;  %v104_v8 = vpop.f32.mrb[1].mxu0  ;;  %v114_v12 = vmul.f32 %v523_v6, %v523_v6 }
  0xe0   :  { %v151_v9 = vmul.f32 2.0, %v104_v8  ;;  %v113_v10 = vmul.f32 %v104_v8, %v104_v8 }
  0xe2   :  { %115 = vadd.xlane.f32.xlu0 %v113_v10  ;;  %v542_v11 = vpack.c.bf16 %v152_v7, %v151_v9  ;;  %v675_v10 = vld [vmem:[%s750_s2] sm:$0xff]  ;;  %s593_s2 = smov [#allocation2]  }
  0xe3   :  { %vm298_vm0 = vcmp.ge.s32.totalorder %v675_v10, 0  ;;  %s478_s24 = sshll.u32 %s593_s2, 4  ;;  %s479_s24 = int_to_ptr.vmem [resolvable:$true] %s478_s24 }
  0xe4   :  { %543 = vmatprep.subr.bf16.mxu1 %v542_v11  ;;  %s567_s25 = scalar_lea.vmem %s479_s24, 16  ;;  %s571_s26 = scalar_lea.vmem %s479_s24, 32 }
  0xe5   :  { %545 = vmatpush3.bf16.xpose.msra.mxu1 %v542_v11  ;;  %p568_p0 = scmp.ne.s32.totalorder %s479_s24, %s567_s25  ;;  %p572_p1 = scmp.lt.s32.totalorder %s479_s24, %s479_s24 }
  0xe6   :  { %117 = vadd.xlane.f32.xlu0 %v114_v12  ;;  %p573_p2 = scmp.lt.s32.totalorder %s571_s26, %s567_s25 }
  0xe8   :  { %p574_p3 = por %p573_p2, %p572_p1 }
  0xea   :  { %p575_p4 = pnand %p574_p3, %p568_p0 }
  0xec   :  { %529 = vmatmul.mubr.f32.vlgmr.msra.gmra.mrb[0].mxu1 %v491_v13 }
  0xed   :  { %531 = vmatprep.mubr.f32.mxu1 %v494_v14 }
  0xf0   :  { %532 = vmatmul.mubr.f32.gmra.mrb[2].mxu1 %v495_v15 }
 0x16f   :  { %v116_v16 = vpop.xlane.xlu0 %115 }
 0x170   :  { %119 = vxpose.xlu1.b32.start [1/2] (short) (narrow) %v116_v16, 8 }
 0x173   :  { %v118_v17 = vpop.xlane.xlu0 %117 }
 0x174   :  { %120 = vxpose.xlu1.b32.end [2/2] (short) (narrow) %v118_v17, 8 }
 0x192   :  { %550 = vset.pattern.permute.xlu1 %v591_v18 }
 0x1bf   :  { %v530_v19 = vpop.f32.mrb[0].mxu1 }
 0x1c0   :  { %v219_v20 = vpop.f32.mrb[1].mxu1 }
 0x1c3   :  { %v533_v21 = vpop.f32.mrb[2].mxu1 }
 0x1c4   :  { %v229_v22 = vpop.f32.mrb[3].mxu1 }
 0x1f0   :  { %v135_v27 = vpop.trf.xlu1 }
 0x1f1   :  { %v241_v28 = vrot.slane %v135_v27, %v240_v25 }
 0x1f3   :  { %v242_v29 = vsub.f32 %v219_v20, %v241_v28  ;;  %v244_v30 = vsub.f32 %v229_v22, %v241_v28  ;;  %v243_v31 = vsub.f32 %v530_v19, %v241_v28  ;;  %v245_v36 = vsub.f32 %v533_v21, %v241_v28 }
 0x1f5   :  { %v250_v32 = vsel %vm248_vm1, %v243_v31, -1e+30  ;;  %v249_v33 = vsel %vm248_vm1, %v242_v29, -1e+30  ;;  %v251_v37 = vsel %vm248_vm1, %v244_v30, -1e+30 }
 0x1f6   :  { %v257_v34 = vsel %vm253_vm2, %v250_v32, -inf  ;;  %v254_v35 = vsel %vm253_vm2, %v249_v33, -inf  ;;  %v260_v38 = vsel %vm253_vm2, %v251_v37, -inf  ;;  %v252_v39 = vsel %vm248_vm1, %v245_v36, -1e+30 }
 0x1f7   :  { %258 = vmax.xlane.f32.xlu1 %v257_v34  ;;  %255 = vmax.xlane.f32.xlu0 %v254_v35  ;;  %v263_v40 = vsel %vm253_vm2, %v252_v39, -inf  ;;  %vm300_vm1 = vcmp.ge.s32.totalorder %v639_v42, 0 }
 0x1fb   :  { %261 = vmax.xlane.f32.xlu0 %v260_v38 }
 0x1ff   :  { %264 = vmax.xlane.f32.xlu0 %v263_v40 }
 0x208   :  { %306 = vperm.xlu1 %550, %v633_v41  }
 0x20c   :  { %309 = vperm.xlu1 %550, %v639_v42  }
 0x210   :  { %312 = vperm.xlu1 %550, %v645_v43  }
 0x284   :  { %v259_v44 = vpop.xlane.xlu1 %258  ;;  %v256_v45 = vpop.xlane.xlu0 %255 }
 0x285   :  { %v648_v46 = vsub.f32 %v250_v32, %v259_v44  ;;  %v650_v47 = vsub.f32 %v249_v33, %v256_v45 }
 0x287   :  { %v270_v48 = vmul.f32 1.442695, %v650_v47  ;;  %vm364_vm3 = vcmp.eq.f32.partialorder %v648_v46, 0.0  ;;  %vm363_vm4 = vcmp.eq.f32.partialorder %v650_v47, 0.0  ;;  %v272_v11 = vmul.f32 1.442695, %v648_v46 }
 0x288   :  { %v262_v49 = vpop.xlane.xlu0 %261  ;;  %v368_v50 = vsel %vm364_vm3, %v623_v26, 16  ;;  %v367_v51 = vsel %vm363_vm4, %v623_v26, 16  ;;  %v307_v18 = vpop.permute.xlu1 %306 }
 0x289   :  { %v657_v52 = vsub.f32 %v251_v37, %v262_v49  ;;  %v386_v53 = vsel %vm253_vm2, %v368_v50, 2147483647  ;;  %551 = vpow2.f32 %v270_v48  ;;  %v371_v55 = vsel %vm253_vm2, %v367_v51, 2147483647 }
 0x28a   :  { %v388_v54 = vshra.s32 %v386_v53, 16  ;;  %v373_v59 = vshra.s32 %v371_v55, 16  ;;  %v387_v17 = vand.u32 65535, %v386_v53  ;;  %v372_v21 = vand.u32 65535, %v371_v55 }
 0x28b   :  { %v274_v56 = vmul.f32 1.442695, %v657_v52  ;;  %vm365_vm5 = vcmp.eq.f32.partialorder %v657_v52, 0.0  ;;  %vm315_vm9 = vcmp.eq.s32.totalorder %v623_v26, %v307_v18  ;;  %v592_v18 = vmov 0.0  }
 0x28c   :  { %v265_v57 = vpop.xlane.xlu0 %264  ;;  %v390_v58 = vcvt.s32.f32 %v388_v54  ;;  %v369_v61 = vsel %vm365_vm5, %v623_v26, 16  ;;  %v375_v62 = vcvt.s32.f32 %v373_v59  ;;  %v389_v20 = vcvt.s32.f32 %v387_v17  ;;  %v310_v23 = vpop.permute.xlu1 %309 }
 0x28d   :  { %553 = vpow2.f32 %v274_v56  ;;  %v663_v60 = vsub.f32 %v252_v39, %v265_v57  ;;  %v401_v1 = vsel %vm253_vm2, %v369_v61, 2147483647  ;;  %v374_v25 = vcvt.s32.f32 %v372_v21 }
 0x28e   :  { %391 = vmin.xlane.f32.xlu0 %v390_v58  ;;  %v403_v5 = vshra.s32 %v401_v1, 16  ;;  %555 = vpow2.f32 %v272_v11  ;;  %v402_v31 = vand.u32 65535, %v401_v1  ;;  %v319_v34 = vsel %vm315_vm9, %v648_v46, 0.0 }
 0x28f   :  { %vm366_vm6 = vcmp.eq.f32.partialorder %v663_v60, 0.0  ;;  %v276_v12 = vmul.f32 1.442695, %v663_v60  ;;  %v325_v37 = vsel %vm253_vm2, %v319_v34, 0.0  ;;  %vm316_vm13 = vcmp.eq.s32.totalorder %v623_v26, %v310_v23 }
 0x290   :  { %v370_v63 = vsel %vm366_vm6, %v623_v26, 16  ;;  %v405_v9 = vcvt.s32.f32 %v403_v5  ;;  %v313_v32 = vpop.permute.xlu1 %312  ;;  %v404_v36 = vcvt.s32.f32 %v402_v31  ;;  %v320_v48 = vsel %vm316_vm13, %v657_v52, 0.0 }
 0x291   :  { %v416_v0 = vsel %vm253_vm2, %v370_v63, 2147483647  ;;  %557 = vpow2.f32 %v276_v12  ;;  %vm317_vm11 = vcmp.eq.s32.totalorder %v623_v26, %v313_v32  ;;  %v328_v49 = vsel %vm253_vm2, %v320_v48, 0.0 }
 0x292   :  { %376 = vmin.xlane.f32.xlu0 %v375_v62  ;;  %v418_v2 = vshra.s32 %v416_v0, 16  ;;  %v417_v27 = vand.u32 65535, %v416_v0  ;;  %v321_v39 = vsel %vm317_vm11, %v663_v60, 0.0  ;;  %vm301_vm5 = vcmp.ge.s32.totalorder %v645_v43, 0 }
 0x293   :  { %v552_v3 = vpop.eup %551  ;;  %v331_v40 = vsel %vm253_vm2, %v321_v39, 0.0  ;;  %vm457_vm13 = vcmp.eq.s32.totalorder %v623_v26, 0 }
 0x294   :  { %v420_v4 = vcvt.s32.f32 %v418_v2  ;;  %v278_v6 = vsel %vm253_vm2, %v552_v3, 0.0  ;;  %v419_v30 = vcvt.s32.f32 %v417_v27 }
 0x295   :  { %279 = vadd.xlane.f32.xlu1 %v278_v6 }
 0x296   :  { %421 = vmin.xlane.f32.xlu0 %v420_v4 }
 0x297   :  { %v554_v7 = vpop.eup %553 }
 0x298   :  { %v284_v8 = vsel %vm253_vm2, %v554_v7, 0.0  ;;  %v556_v13 = vpop.eup %555 }
 0x299   :  { %285 = vadd.xlane.f32.xlu1 %v284_v8  ;;  %v281_v14 = vsel %vm253_vm2, %v556_v13, 0.0 }
 0x29a   :  { %406 = vmin.xlane.f32.xlu0 %v405_v9 }
 0x29b   :  { %v558_v15 = vpop.eup %557 }
 0x29c   :  { %v287_v16 = vsel %vm253_vm2, %v558_v15, 0.0 }
 0x2b0   :  { %303 = vperm.xlu0 %549, %v675_v10  }
 0x2cf   :  { %282 = vadd.xlane.f32.xlu0 %v281_v14 }
 0x2d3   :  { %288 = vadd.xlane.f32.xlu0 %v287_v16 }
 0x31b   :  { %v392_v19 = vpop.xlane.xlu0 %391 }
 0x31c   :  { %vm393_vm7 = vcmp.eq.f32.partialorder %v390_v58, %v392_v19  ;;  %v398_v57 = vcvt.f32.s32 %v392_v19 }
 0x31d   :  { %v394_v22 = vsel %vm393_vm7, %v389_v20, inf }
 0x31e   :  { %395 = vmin.xlane.f32.xlu0 %v394_v22  ;;  %v399_v61 = vshll.u32 %v398_v57, 16 }
 0x31f   :  { %v377_v24 = vpop.xlane.xlu0 %376 }
 0x320   :  { %vm378_vm8 = vcmp.eq.f32.partialorder %v375_v62, %v377_v24  ;;  %v383_v58 = vcvt.f32.s32 %v377_v24 }
 0x321   :  { %v379_v28 = vsel %vm378_vm8, %v374_v25, inf }
 0x322   :  { %380 = vmin.xlane.f32.xlu1 %v379_v28  ;;  %v280_v50 = vpop.xlane.xlu1 %279  ;;  %v384_v2 = vshll.u32 %v383_v58, 16 }
 0x323   :  { %v683_v29 = vpop.xlane.xlu0 %421 }
 0x324   :  { %vm423_vm10 = vcmp.eq.f32.partialorder %v420_v4, %v683_v29  ;;  %v428_v6 = vcvt.f32.s32 %v683_v29 }
 0x325   :  { %v424_v33 = vsel %vm423_vm10, %v419_v30, inf }
 0x326   :  { %425 = vmin.xlane.f32.xlu0 %v424_v33  ;;  %v286_v53 = vpop.xlane.xlu1 %285  ;;  %v429_v17 = vshll.u32 %v428_v6, 16 }
 0x327   :  { %v688_v35 = vpop.xlane.xlu0 %406 }
 0x328   :  { %vm408_vm12 = vcmp.eq.f32.partialorder %v405_v9, %v688_v35  ;;  %v413_v14 = vcvt.f32.s32 %v688_v35 }
 0x329   :  { %v409_v38 = vsel %vm408_vm12, %v404_v36, inf  ;;  %vm458_vm12 = vcmp.eq.s32.totalorder %v623_v26, 1 }
 0x32a   :  { %326 = vadd.xlane.f32.xlu0 %v325_v37  ;;  %410 = vmin.xlane.f32.xlu1 %v409_v38  ;;  %v414_v24 = vshll.u32 %v413_v14, 16 }
 0x32e   :  { %332 = vadd.xlane.f32.xlu0 %v331_v40 }
 0x32f   :  { %v304_v44 = vpop.permute.xlu0 %303 }
 0x330   :  { %vm314_vm14 = vcmp.eq.s32.totalorder %v623_v26, %v304_v44 }
 0x331   :  { %v318_v45 = vsel %vm314_vm14, %v650_v47, 0.0 }
 0x332   :  { %v322_v46 = vsel %vm253_vm2, %v318_v45, 0.0  ;;  %vm338_vm2 = vcmask 7168  }
 0x333   :  { %323 = vadd.xlane.f32.xlu1 %v322_v46 }
 0x337   :  { %329 = vadd.xlane.f32.xlu1 %v328_v49 }
 0x35c   :  { %v283_v51 = vpop.xlane.xlu0 %282 }
 0x35d   :  { %559 = vlog2.f32 %v283_v51 }
 0x35e   :  { %561 = vlog2.f32 %v280_v50 }
 0x35f   :  { %563 = vlog2.f32 %v286_v53 }
 0x360   :  { %v289_v54 = vpop.xlane.xlu0 %288 }
 0x361   :  { %565 = vlog2.f32 %v289_v54 }
 0x367   :  { %v560_v55 = vpop.eup %559 }
 0x368   :  { %v562_v56 = vpop.eup %561  ;;  %v293_v47 = vmul.f32 0.6931472, %v560_v55 }
 0x369   :  { %v291_v59 = vmul.f32 0.6931472, %v562_v56  ;;  %v564_v60 = vpop.eup %563 }
 0x36a   :  { %v335_v63 = vsel %vm299_vm15, %v293_v47, 0.0  ;;  %v295_v4 = vmul.f32 0.6931472, %v564_v60 }
 0x36b   :  { %v566_v0 = vpop.eup %565  ;;  %v334_v3 = vsel %vm298_vm0, %v291_v59, 0.0  ;;  %v340_v7 = vsel %vm338_vm2, %v335_v63, 0.0 }
 0x36c   :  { %v297_v9 = vmul.f32 0.6931472, %v566_v0  ;;  %v339_v11 = vsel %vm338_vm2, %v334_v3, 0.0  ;;  %v336_v13 = vsel %vm300_vm1, %v295_v4, 0.0 }
 0x36d   :  { %v341_v15 = vadd.f32 %v340_v7, %v339_v11  ;;  %v342_v21 = vsel %vm338_vm2, %v336_v13, 0.0 }
 0x36f   :  { %v343_v25 = vadd.f32 %v342_v21, %v341_v15 }
 0x3ab   :  { %v396_v52 = vpop.xlane.xlu0 %395 }
 0x3ac   :  { %v397_v62 = vcvt.f32.s32 %v396_v52 }
 0x3ae   :  { %v400_v1 = vadd.s32 %v399_v61, %v397_v62 }
 0x3af   :  { %v381_v5 = vpop.xlane.xlu1 %380 }
 0x3b0   :  { %vm432_vm3 = vcmp.eq.s32.totalorder %v400_v1, %v633_v41  ;;  %v382_v8 = vcvt.f32.s32 %v381_v5  ;;  %v337_v41 = vsel %vm301_vm5, %v297_v9, 0.0 }
 0x3b1   :  { %vm436_vm4 = vmand %vm432_vm3, %vm299_vm15  ;;  %v344_v30 = vsel %vm338_vm2, %v337_v41, 0.0 }
 0x3b2   :  { %v385_v12 = vadd.s32 %v384_v2, %v382_v8  ;;  %v440_v19 = vsel %vm436_vm4, 1.0, %v592_v18 }
 0x3b3   :  { %v426_v16 = vpop.xlane.xlu0 %425  ;;  %v444_v27 = vsel %vm338_vm2, %v440_v19, 0.0 }
 0x3b4   :  { %vm431_vm6 = vcmp.eq.s32.totalorder %v385_v12, %v675_v10  ;;  %v427_v20 = vcvt.f32.s32 %v426_v16  ;;  %v345_v10 = vadd.f32 %v344_v30, %v343_v25 }
 0x3b5   :  { %vm435_vm7 = vmand %vm431_vm6, %vm298_vm0 }
 0x3b6   :  { %v439_v22 = vsel %vm435_vm7, 1.0, %v592_v18  ;;  %v430_v23 = vadd.s32 %v429_v17, %v427_v20  ;;  %v346_v36 = vrot.slane %v345_v10, 4 }
 0x3b7   :  { %v443_v28 = vsel %vm338_vm2, %v439_v22, 0.0  ;;  %v411_v29 = vpop.xlane.xlu1 %410  ;;  %v327_v39 = vpop.xlane.xlu0 %326 }
 0x3b8   :  { %v445_v31 = vadd.f32 %v444_v27, %v443_v28  ;;  %vm434_vm8 = vcmp.eq.s32.totalorder %v430_v23, %v645_v43  ;;  %v412_v32 = vcvt.f32.s32 %v411_v29  ;;  %v347_v46 = vadd.f32 %v346_v36, %v345_v10 }
 0x3b9   :  { %vm438_vm9 = vmand %vm434_vm8, %vm301_vm5 }
 0x3ba   :  { %v415_v33 = vadd.s32 %v414_v24, %v412_v32  ;;  %v442_v34 = vsel %vm438_vm9, 1.0, %v592_v18  ;;  %v348_v54 = vrot.slane %v347_v46, 2 }
 0x3bb   :  { %v448_v44 = vsel %vm338_vm2, %v442_v34, 0.0  ;;  %v333_v51 = vpop.xlane.xlu0 %332 }
 0x3bc   :  { %vm433_vm10 = vcmp.eq.s32.totalorder %v415_v33, %v639_v42  ;;  %v349_v58 = vadd.f32 %v348_v54, %v347_v46 }
 0x3bd   :  { %vm437_vm11 = vmand %vm433_vm10, %vm300_vm1 }
 0x3be   :  { %v441_v35 = vsel %vm437_vm11, 1.0, %v592_v18  ;;  %v350_v62 = vrot.slane %v349_v58, 1 }
 0x3bf   :  { %v446_v37 = vsel %vm338_vm2, %v441_v35, 0.0 }
 0x3c0   :  { %v447_v38 = vadd.f32 %v446_v37, %v445_v31  ;;  %v324_v40 = vpop.xlane.xlu1 %323  ;;  %v351_v1 = vadd.f32 %v350_v62, %v349_v58 }
 0x3c1   :  { %v352_v48 = vadd.f32 %v327_v39, %v324_v40 }
 0x3c2   :  { %v449_v45 = vadd.f32 %v448_v44, %v447_v38 }
 0x3c4   :  { %v330_v43 = vpop.xlane.xlu1 %329  ;;  %v450_v49 = vrot.slane %v449_v45, 4 }
 0x3c5   :  { %v353_v50 = vadd.f32 %v352_v48, %v330_v43 }
 0x3c6   :  { %v451_v53 = vadd.f32 %v450_v49, %v449_v45 }
 0x3c7   :  { %v354_v42 = vadd.f32 %v353_v50, %v333_v51 }
 0x3c8   :  { %v452_v55 = vrot.slane %v451_v53, 2 }
 0x3c9   :  { %v355_v56 = vrot.slane %v354_v42, 4 }
 0x3ca   :  { %v453_v57 = vadd.f32 %v452_v55, %v451_v53 }
 0x3cb   :  { %v356_v47 = vadd.f32 %v355_v56, %v354_v42 }
 0x3cc   :  { %v454_v59 = vrot.slane %v453_v57, 1 }
 0x3cd   :  { %v357_v52 = vrot.slane %v356_v47, 2 }
 0x3ce   :  { %v455_v60 = vadd.f32 %v454_v59, %v453_v57 }
 0x3cf   :  { %v358_v61 = vadd.f32 %v357_v52, %v356_v47 }
 0x3d0   :  { %v456_v63 = vmul.f32 0.09090909, %v455_v60 }
 0x3d1   :  { %v359_v0 = vrot.slane %v358_v61, 1 }
 0x3d2   :  { %461 = vperm.xlu1 %550, %v456_v63  }
 0x3d3   :  { %v360_v2 = vadd.f32 %v359_v0, %v358_v61 }
 0x3d5   :  { %v361_v3 = vsub.f32 %v351_v1, %v360_v2 }
 0x3d7   :  { %v362_v4 = vmul.f32 0.09090909, %v361_v3 }
 0x3d9   :  { %467 = vperm.xlu0 %549, %v362_v4  }
 0x451   :  { %v462_v5 = vpop.permute.xlu1 %461 }
 0x452   :  { %v464_v6 = vsel %vm458_vm12, %v462_v5, 0.0 }
 0x458   :  { %v468_v7 = vpop.permute.xlu0 %467 }
 0x459   :  { %v470_v8 = vsel %vm457_vm13, %v468_v7, %v464_v6 }
 0x45a   :  { %471 = vst [vmem:[#allocation2] sm:$0x1] %v470_v8 }
 0x45b   :  { %578 = shalt.err (!%p575_p4)
}
 0x45c   :  { %s579_s29 = scalar_lea.hbm %s751_s3, 16 }
 0x45d   :  { %p580_p5 = scmp.ne.s32.totalorder %s751_s3, %s579_s29  ;;  %p583_p6 = scmp.lt.u32.totalorder %s579_s29, %s751_s3 }
 0x45f   :  { %p585_p7 = pnand %p583_p6, %p580_p5 }
 0x461   :  { %588 = shalt.err (!%p585_p7)
}
 0x462   :  { %481 = dma.vmem_to_hbm [thread:$0]  %s479_s24, 16, %s751_s3, [#allocation3]  }
 0x463   :  { %589 = dma.done.wait [#allocation3], 16  }
 0x464   :  { %590 = vsyncadd [#allocation3], 4294967280 }
 0x465   :  { %485 = vsyncpa [#allocation3], 1 }

</bundles_post_ra>
